<compile_context>
chip_gen: v7x
topology: tpu7x:2x2x1
jax: 0.10.0
libtpu: 0.0.40
codegen_flags: <defaults>
</compile_context>

<pallas_src>
import functools

import jax
import jax.numpy as jnp
from jax.experimental import pallas as pl
from jax.experimental.pallas import tpu as pltpu


def _round_up(n, m):
    return ((n + m - 1) // m) * m


def _tpu_kind():
    try:
        return jax.devices()[0].device_kind.lower()
    except Exception:
        return ""


def _plan(hidden_dim):
    """Static per-generation kernel configuration."""
    kind = _tpu_kind()
    is_v5 = "v5" in kind
    is_v7 = "v7" in kind
    is_v6 = "v6" in kind
    return dict(
        # Block-diagonal (2H,2H) layer-2 matmul fills the 256-wide MXU on v6e/v7x;
        # on v5e (128^2 MXU) it would double passes for zero FLOPs.
        layer2_fused=(not is_v5) and (2 * hidden_dim <= 256),
        # bf16 VPU/EUP exists on v6e/v7x; v5e keeps f32 elementwise.
        mish_bf16=(is_v6 or is_v7),
        # v7x has 2 TensorCores per chip.
        num_tc=2 if is_v7 else 1,
        # v5e scoped-VMEM default is only 16 MiB; bump for large batch tiles.
        vmem_limit_bytes=(64 * 1024 * 1024) if is_v5 else None,
    )


def _mish_bf16_out(s, mish_bf16):
    """mish(s) = s * tanh(softplus(s)); returns bf16 for the next MXU matmul.

    Single-exp rewrite: tanh(softplus(s)) = t(t+2)/(t(t+2)+2), t = exp(s),
    clamped at s=20 (mish(s) ~= s there) so exp stays finite.
    """
    if mish_bf16:
        s = s.astype(jnp.bfloat16)
        t = jnp.exp(jnp.minimum(s, 20.0))
        u = t * (t + 2.0)
        tsp = u / (u + 2.0)
        return jnp.where(s > 20.0, s, s * tsp)          # already bf16
    t = jnp.exp(jnp.minimum(s, 20.0))
    u = t * (t + 2.0)
    tsp = u * pl.reciprocal(u + 2.0, approx=True)       # EUP vrcp, f32
    return jnp.where(s > 20.0, s, s * tsp).astype(jnp.bfloat16)


def _double_critic_kernel_fused(x_ref, w1_ref, b1_ref, w2_ref, b2_ref,
                                w3_ref, b3_ref, q_ref, *, mish_bf16):
    """Fully fused heads: layer 2 is one block-diagonal (2H,2H) matmul (v6e/v7x)."""
    x = x_ref[...]                                                      # (TB, in) bf16
    s1 = jnp.dot(x, w1_ref[...], preferred_element_type=jnp.float32) + b1_ref[...]
    h1 = _mish_bf16_out(s1, mish_bf16)                                  # (TB, 2H) bf16
    s2 = jnp.dot(h1, w2_ref[...], preferred_element_type=jnp.float32) + b2_ref[...]
    h2 = _mish_bf16_out(s2, mish_bf16)                                  # (TB, 2H) bf16
    q_ref[...] = (jnp.dot(h2, w3_ref[...], preferred_element_type=jnp.float32)
                  + b3_ref[...])                                        # (TB, 2) f32


def _double_critic_kernel_split(x_ref, w1_ref, b1_ref, w2a_ref, w2b_ref, b2_ref,
                                w3a_ref, w3b_ref, b3_ref, q_ref, *, mish_bf16):
    """Per-head layer 2/3 (v5e or 2H > 256); no (TB, 2H) lane concatenate."""
    H = w2a_ref.shape[0]
    x = x_ref[...]
    s1 = jnp.dot(x, w1_ref[...], preferred_element_type=jnp.float32) + b1_ref[...]
    h1 = _mish_bf16_out(s1, mish_bf16)                                  # (TB, 2H)
    sA = (jnp.dot(h1[:, :H], w2a_ref[...], preferred_element_type=jnp.float32)
          + b2_ref[:, :H])
    sB = (jnp.dot(h1[:, H:], w2b_ref[...], preferred_element_type=jnp.float32)
          + b2_ref[:, H:])
    hA = _mish_bf16_out(sA, mish_bf16)
    hB = _mish_bf16_out(sB, mish_bf16)
    qA = jnp.dot(hA, w3a_ref[...], preferred_element_type=jnp.float32)  # (TB, 1)
    qB = jnp.dot(hB, w3b_ref[...], preferred_element_type=jnp.float32)  # (TB, 1)
    q_ref[...] = jnp.concatenate([qA, qB], axis=-1) + b3_ref[...]       # tiny concat


def fuse_double_critic_params(params, *, layer2_fused):
    """Fold the two critic heads into fused bf16 weights ONCE (at init, not per call).

    params: 12 f32 arrays (w1a,b1a,w2a,b2a,w3a,b3a, w1b,b1b,w2b,b2b,w3b,b3b),
    weights (in_features, out_features), biases (1, out_features).
    """
    (w1a, b1a, w2a, b2a, w3a, b3a,
     w1b, b1b, w2b, b2b, w3b, b3b) = params
    H = w2a.shape[0]
    w1 = jnp.concatenate([w1a, w1b], axis=1).astype(jnp.bfloat16)       # (in, 2H)
    b1 = jnp.concatenate([b1a, b1b], axis=1)                            # (1, 2H)
    b2 = jnp.concatenate([b2a, b2b], axis=1)                            # (1, 2H)
    b3 = jnp.concatenate([b3a, b3b], axis=1)                            # (1, 2)
    if layer2_fused:
        zhh = jnp.zeros((H, H), jnp.float32)
        w2 = jnp.concatenate(
            [jnp.concatenate([w2a, zhh], axis=1),
             jnp.concatenate([zhh, w2b], axis=1)], axis=0).astype(jnp.bfloat16)
        zc = jnp.zeros((H, 1), jnp.float32)
        w3 = jnp.concatenate(
            [jnp.concatenate([w3a, zc], axis=1),
             jnp.concatenate([zc, w3b], axis=1)], axis=0).astype(jnp.bfloat16)
        return (w1, b1, w2, b2, w3, b3)
    return (w1, b1, w2a.astype(jnp.bfloat16), w2b.astype(jnp.bfloat16), b2,
            w3a.astype(jnp.bfloat16), w3b.astype(jnp.bfloat16), b3)


def double_critic_forward(x, fused_params, *, layer2_fused, mish_bf16,
                          num_tc=1, vmem_limit_bytes=None, batch_tile=2048):
    """x: (B, state_dim + action_dim) f32. Returns (q1, q2), each (B, 1) f32."""
    B, in_dim = x.shape
    if layer2_fused:
        w1, b1, w2, b2, w3, b3 = fused_params
        H2 = w2.shape[0]                        # 2H
    else:
        w1, b1, w2a, w2b, b2, w3a, w3b, b3 = fused_params
        H2 = 2 * w2a.shape[0]

    # Batch tile: multiple of 16 (bf16 sublane packing), large cap (2048) to amortize
    # the ~0.35us per-grid-step overhead; on v7x split so >= 2 grid steps exist and
    # both TensorCores are used (grid axis is "parallel").
    per_core = pl.cdiv(B, num_tc) if (num_tc > 1 and B > 64) else B
    TB = max(16, min(batch_tile, _round_up(per_core, 16)))
    Bp = _round_up(B, TB)
    if Bp != B:
        x = jnp.pad(x, ((0, Bp - B), (0, 0)))
    xb = x.astype(jnp.bfloat16)

    resident = lambda i: (0, 0)   # weights/biases: same block every grid step
    if layer2_fused:
        kernel = functools.partial(_double_critic_kernel_fused, mish_bf16=mish_bf16)
        in_specs = [
            pl.BlockSpec((TB, in_dim), lambda i: (i, 0)),   # x: tiled over batch
            pl.BlockSpec((in_dim, H2), resident),           # w1 (fused heads)
            pl.BlockSpec((1, H2), resident),                # b1
            pl.BlockSpec((H2, H2), resident),               # w2 (block-diagonal)
            pl.BlockSpec((1, H2), resident),                # b2
            pl.BlockSpec((H2, 2), resident),                # w3 (block-structured)
            pl.BlockSpec((1, 2), resident),                 # b3
        ]
        args = (xb, w1, b1, w2, b2, w3, b3)
    else:
        H = H2 // 2
        kernel = functools.partial(_double_critic_kernel_split, mish_bf16=mish_bf16)
        in_specs = [
            pl.BlockSpec((TB, in_dim), lambda i: (i, 0)),
            pl.BlockSpec((in_dim, H2), resident),
            pl.BlockSpec((1, H2), resident),
            pl.BlockSpec((H, H), resident),                 # w2a
            pl.BlockSpec((H, H), resident),                 # w2b
            pl.BlockSpec((1, H2), resident),
            pl.BlockSpec((H, 1), resident),                 # w3a
            pl.BlockSpec((H, 1), resident),                 # w3b
            pl.BlockSpec((1, 2), resident),
        ]
        args = (xb, w1, b1, w2a, w2b, b2, w3a, w3b, b3)

    q = pl.pallas_call(
        kernel,
        out_shape=jax.ShapeDtypeStruct((Bp, 2), jnp.float32),
        grid=(Bp // TB,),
        in_specs=in_specs,
        out_specs=pl.BlockSpec((TB, 2), lambda i: (i, 0)),
        compiler_params=pltpu.CompilerParams(
            dimension_semantics=("parallel",),
            vmem_limit_bytes=vmem_limit_bytes),
    )(*args)
    return q[:B, 0:1], q[:B, 1:2]


def obs_processor(obs, window_size=5):
    """ObsProcessor with use_lstm=False (as constructed inside DoubleCritic):
    window features (ndim==3, last dim == window_size) are skipped; every other
    (batch, clients) feature gets a trailing singleton axis and is concatenated."""
    # TODO(synk): LSTM branch (use_lstm=True) not implemented — never taken here.
    feats = []
    for key in sorted(obs.keys()):
        v = jnp.asarray(obs[key], dtype=jnp.float32)
        if v.ndim == 3 and v.shape[-1] == window_size:
            continue
        feats.append(v[..., None])
    return jnp.concatenate(feats, axis=-1)


def init_linear(key, in_dim, out_dim):
    kw, kb = jax.random.split(key)
    bound = 1.0 / jnp.sqrt(jnp.float32(in_dim))
    w = jax.random.uniform(kw, (in_dim, out_dim), jnp.float32, -bound, bound)
    b = jax.random.uniform(kb, (1, out_dim), jnp.float32, -bound, bound)
    return w, b


def init_double_critic(key, state_dim, action_dim, hidden_dim=256):
    in_dim = state_dim + action_dim
    keys = jax.random.split(key, 6)
    w1a, b1a = init_linear(keys[0], in_dim, hidden_dim)
    w2a, b2a = init_linear(keys[1], hidden_dim, hidden_dim)
    w3a, b3a = init_linear(keys[2], hidden_dim, 1)
    w1b, b1b = init_linear(keys[3], in_dim, hidden_dim)
    w2b, b2b = init_linear(keys[4], hidden_dim, hidden_dim)
    w3b, b3b = init_linear(keys[5], hidden_dim, 1)
    return (w1a, b1a, w2a, b2a, w3a, b3a,
            w1b, b1b, w2b, b2b, w3b, b3b)


if __name__ == "__main__":
    key = jax.random.PRNGKey(0)
    k_obs1, k_obs2, k_win, k_act, k_params, k_big = jax.random.split(key, 6)

    batch, clients, window_size = 2, 4, 5
    action_dim, hidden_dim = 4, 128   # 128 keeps head slices lane-aligned, 2H=256 MXU

    obs = {
        "cpu": jax.random.normal(k_obs1, (batch, clients), jnp.float32),
        "mem": jax.random.normal(k_obs2, (batch, clients), jnp.float32),
        "win": jax.random.normal(k_win, (batch, clients, window_size), jnp.float32),
    }
    act = jax.random.normal(k_act, (batch, action_dim), jnp.float32)

    # ObsProcessor + flatten (glue, plain JAX)
    obs_feat = obs_processor(obs, window_size)          # (batch, clients, 2)
    obs_flat = obs_feat.reshape(batch, -1)              # (batch, clients*2)
    act_flat = act.reshape(batch, -1)                   # (batch, action_dim)
    x = jnp.concatenate([obs_flat, act_flat], axis=1)   # (batch, state+action)

    state_dim = obs_flat.shape[1]
    params = init_double_critic(k_params, state_dim, action_dim, hidden_dim)

    # Per-generation plan + one-time weight fusion (hoisted out of the forward).
    plan = _plan(hidden_dim)
    fused = jax.block_until_ready(
        fuse_double_critic_params(params, layer2_fused=plan["layer2_fused"]))
    forward = jax.jit(functools.partial(double_critic_forward, **plan))

    q1, q2 = forward(x, fused)
    q1 = jax.block_until_ready(q1)
    q2 = jax.block_until_ready(q2)

    # Plain-JAX f32 reference (exact Mish); tolerance loosened for bf16 MXU operands
    # and the bf16/approx-reciprocal Mish in the kernel.
    def ref_mish(v):
        return v * jnp.tanh(jax.nn.softplus(v))

    def ref_mlp(xx, w1, b1, w2, b2, w3, b3):
        h = ref_mish(xx @ w1 + b1)
        h = ref_mish(h @ w2 + b2)
        return h @ w3 + b3

    r1 = ref_mlp(x, *params[:6])
    r2 = ref_mlp(x, *params[6:])
    assert q1.shape == (batch, 1) and q2.shape == (batch, 1)
    assert jnp.allclose(q1, r1, rtol=6e-2, atol=6e-2), (q1, r1)
    assert jnp.allclose(q2, r2, rtol=6e-2, atol=6e-2), (q2, r2)

    # Second run at a non-multiple-of-tile batch to exercise padding / multi-step grid.
    xb_big = jax.random.normal(k_big, (300, state_dim + action_dim), jnp.float32)
    qb1, qb2 = forward(xb_big, fused)
    qb1 = jax.block_until_ready(qb1)
    qb2 = jax.block_until_ready(qb2)
    rb1 = ref_mlp(xb_big, *params[:6])
    rb2 = ref_mlp(xb_big, *params[6:])
    assert qb1.shape == (300, 1) and qb2.shape == (300, 1)
    assert jnp.allclose(qb1, rb1, rtol=6e-2, atol=6e-2)
    assert jnp.allclose(qb2, rb2, rtol=6e-2, atol=6e-2)

    print("KERNEL_OK")
</pallas_src>

<mosaic_0001>
module attributes {stable_mosaic.version = 11 : i64} {
  func.func @_double_critic_kernel_fused(%arg0: i32, %arg1: memref<16x12xbf16, #tpu.memory_space<vmem>>, %arg2: memref<12x256xbf16, #tpu.memory_space<vmem>>, %arg3: memref<1x256xf32, #tpu.memory_space<vmem>>, %arg4: memref<256x256xbf16, #tpu.memory_space<vmem>>, %arg5: memref<1x256xf32, #tpu.memory_space<vmem>>, %arg6: memref<256x2xbf16, #tpu.memory_space<vmem>>, %arg7: memref<1x2xf32, #tpu.memory_space<vmem>>, %arg8: memref<16x2xf32, #tpu.memory_space<vmem>>) attributes {dimension_semantics = [#tpu.dimension_semantics<parallel>], iteration_bounds = array<i64: 1>, scalar_prefetch = 0 : i64, scratch_operands = 0 : i64, tpu.core_type = #tpu.core_type<tc>, window_params = [{transform_indices = @transform_0, window_bounds = array<i64: 16, 12>}, {pipeline_mode = #tpu.pipeline_mode<synchronous>, transform_indices = @transform_1, window_bounds = array<i64: 12, 256>}, {pipeline_mode = #tpu.pipeline_mode<synchronous>, transform_indices = @transform_2, window_bounds = array<i64: 1, 256>}, {pipeline_mode = #tpu.pipeline_mode<synchronous>, transform_indices = @transform_3, window_bounds = array<i64: 256, 256>}, {pipeline_mode = #tpu.pipeline_mode<synchronous>, transform_indices = @transform_4, window_bounds = array<i64: 1, 256>}, {pipeline_mode = #tpu.pipeline_mode<synchronous>, transform_indices = @transform_5, window_bounds = array<i64: 256, 2>}, {pipeline_mode = #tpu.pipeline_mode<synchronous>, transform_indices = @transform_6, window_bounds = array<i64: 1, 2>}, {transform_indices = @transform_7, window_bounds = array<i64: 16, 2>}]} {
    %c0 = arith.constant 0 : index
    %c0_0 = arith.constant 0 : index
    %0 = vector.load %arg1[%c0, %c0_0] : memref<16x12xbf16, #tpu.memory_space<vmem>>, vector<16x12xbf16>
    %c0_1 = arith.constant 0 : index
    %c0_2 = arith.constant 0 : index
    %1 = vector.load %arg2[%c0_1, %c0_2] : memref<12x256xbf16, #tpu.memory_space<vmem>>, vector<12x256xbf16>
    %cst = arith.constant dense<0.000000e+00> : vector<16x256xf32>
    %2 = tpu.matmul %0, %1, %cst {dimension_numbers = #tpu.dot_dimension_numbers<[1], [0], [0], [1], [0, 0, 1, 1], [], []>} : vector<16x12xbf16>, vector<12x256xbf16>, vector<16x256xf32> -> vector<16x256xf32>
    %c0_3 = arith.constant 0 : index
    %c0_4 = arith.constant 0 : index
    %3 = vector.load %arg3[%c0_3, %c0_4] : memref<1x256xf32, #tpu.memory_space<vmem>>, vector<1x256xf32>
    %4 = vector.broadcast %3 : vector<1x256xf32> to vector<16x256xf32>
    %5 = arith.addf %2, %4 : vector<16x256xf32>
    %cst_5 = arith.constant 2.000000e+01 : f32
    %6 = vector.broadcast %cst_5 : f32 to vector<16x256xf32>
    %7 = arith.minimumf %5, %6 : vector<16x256xf32>
    %8 = math.exp %7 : vector<16x256xf32>
    %cst_6 = arith.constant 2.000000e+00 : f32
    %9 = vector.broadcast %cst_6 : f32 to vector<16x256xf32>
    %10 = arith.addf %8, %9 : vector<16x256xf32>
    %11 = arith.mulf %8, %10 : vector<16x256xf32>
    %cst_7 = arith.constant 2.000000e+00 : f32
    %12 = vector.broadcast %cst_7 : f32 to vector<16x256xf32>
    %13 = arith.addf %11, %12 : vector<16x256xf32>
    %14 = tpu.reciprocal %13 {approx = true} : vector<16x256xf32> -> vector<16x256xf32>
    %15 = arith.mulf %11, %14 : vector<16x256xf32>
    %cst_8 = arith.constant 2.000000e+01 : f32
    %16 = vector.broadcast %cst_8 : f32 to vector<16x256xf32>
    %17 = arith.cmpf ogt, %5, %16 : vector<16x256xf32>
    %18 = arith.mulf %5, %15 : vector<16x256xf32>
    %19 = arith.select %17, %5, %18 : vector<16x256xi1>, vector<16x256xf32>
    %20 = arith.truncf %19 : vector<16x256xf32> to vector<16x256xbf16>
    %c0_9 = arith.constant 0 : index
    %c0_10 = arith.constant 0 : index
    %21 = vector.load %arg4[%c0_9, %c0_10] : memref<256x256xbf16, #tpu.memory_space<vmem>>, vector<256x256xbf16>
    %cst_11 = arith.constant dense<0.000000e+00> : vector<16x256xf32>
    %22 = tpu.matmul %20, %21, %cst_11 {dimension_numbers = #tpu.dot_dimension_numbers<[1], [0], [0], [1], [0, 0, 1, 1], [], []>} : vector<16x256xbf16>, vector<256x256xbf16>, vector<16x256xf32> -> vector<16x256xf32>
    %c0_12 = arith.constant 0 : index
    %c0_13 = arith.constant 0 : index
    %23 = vector.load %arg5[%c0_12, %c0_13] : memref<1x256xf32, #tpu.memory_space<vmem>>, vector<1x256xf32>
    %24 = vector.broadcast %23 : vector<1x256xf32> to vector<16x256xf32>
    %25 = arith.addf %22, %24 : vector<16x256xf32>
    %cst_14 = arith.constant 2.000000e+01 : f32
    %26 = vector.broadcast %cst_14 : f32 to vector<16x256xf32>
    %27 = arith.minimumf %25, %26 : vector<16x256xf32>
    %28 = math.exp %27 : vector<16x256xf32>
    %cst_15 = arith.constant 2.000000e+00 : f32
    %29 = vector.broadcast %cst_15 : f32 to vector<16x256xf32>
    %30 = arith.addf %28, %29 : vector<16x256xf32>
    %31 = arith.mulf %28, %30 : vector<16x256xf32>
    %cst_16 = arith.constant 2.000000e+00 : f32
    %32 = vector.broadcast %cst_16 : f32 to vector<16x256xf32>
    %33 = arith.addf %31, %32 : vector<16x256xf32>
    %34 = tpu.reciprocal %33 {approx = true} : vector<16x256xf32> -> vector<16x256xf32>
    %35 = arith.mulf %31, %34 : vector<16x256xf32>
    %cst_17 = arith.constant 2.000000e+01 : f32
    %36 = vector.broadcast %cst_17 : f32 to vector<16x256xf32>
    %37 = arith.cmpf ogt, %25, %36 : vector<16x256xf32>
    %38 = arith.mulf %25, %35 : vector<16x256xf32>
    %39 = arith.select %37, %25, %38 : vector<16x256xi1>, vector<16x256xf32>
    %40 = arith.truncf %39 : vector<16x256xf32> to vector<16x256xbf16>
    %c0_18 = arith.constant 0 : index
    %c0_19 = arith.constant 0 : index
    %41 = vector.load %arg6[%c0_18, %c0_19] : memref<256x2xbf16, #tpu.memory_space<vmem>>, vector<256x2xbf16>
    %cst_20 = arith.constant dense<0.000000e+00> : vector<16x2xf32>
    %42 = tpu.matmul %40, %41, %cst_20 {dimension_numbers = #tpu.dot_dimension_numbers<[1], [0], [0], [1], [0, 0, 1, 1], [], []>} : vector<16x256xbf16>, vector<256x2xbf16>, vector<16x2xf32> -> vector<16x2xf32>
    %c0_21 = arith.constant 0 : index
    %c0_22 = arith.constant 0 : index
    %43 = vector.load %arg7[%c0_21, %c0_22] : memref<1x2xf32, #tpu.memory_space<vmem>>, vector<1x2xf32>
    %44 = vector.broadcast %43 : vector<1x2xf32> to vector<16x2xf32>
    %45 = arith.addf %42, %44 : vector<16x2xf32>
    %c0_23 = arith.constant 0 : index
    %c0_24 = arith.constant 0 : index
    %46 = vector.load %arg8[%c0_23, %c0_24] : memref<16x2xf32, #tpu.memory_space<vmem>>, vector<16x2xf32>
    tpu.vector_store %arg8[%c0_23, %c0_24], %45 {strides = array<i32>} : memref<16x2xf32, #tpu.memory_space<vmem>>, vector<16x2xf32>,
    return
  }
  func.func @transform_0(%arg0: i32) -> (i32, i32) {
    %c0_i32 = arith.constant 0 : i32
    %c0_i32_0 = arith.constant 0 : i32
    return %arg0, %c0_i32 : i32, i32
  }
  func.func @transform_1(%arg0: i32) -> (i32, i32) {
    %c0_i32 = arith.constant 0 : i32
    %c0_i32_0 = arith.constant 0 : i32
    %c0_i32_1 = arith.constant 0 : i32
    return %c0_i32, %c0_i32_0 : i32, i32
  }
  func.func @transform_2(%arg0: i32) -> (i32, i32) {
    %c0_i32 = arith.constant 0 : i32
    %c0_i32_0 = arith.constant 0 : i32
    %c0_i32_1 = arith.constant 0 : i32
    return %c0_i32, %c0_i32_0 : i32, i32
  }
  func.func @transform_3(%arg0: i32) -> (i32, i32) {
    %c0_i32 = arith.constant 0 : i32
    %c0_i32_0 = arith.constant 0 : i32
    %c0_i32_1 = arith.constant 0 : i32
    return %c0_i32, %c0_i32_0 : i32, i32
  }
  func.func @transform_4(%arg0: i32) -> (i32, i32) {
    %c0_i32 = arith.constant 0 : i32
    %c0_i32_0 = arith.constant 0 : i32
    %c0_i32_1 = arith.constant 0 : i32
    return %c0_i32, %c0_i32_0 : i32, i32
  }
  func.func @transform_5(%arg0: i32) -> (i32, i32) {
    %c0_i32 = arith.constant 0 : i32
    %c0_i32_0 = arith.constant 0 : i32
    %c0_i32_1 = arith.constant 0 : i32
    return %c0_i32, %c0_i32_0 : i32, i32
  }
  func.func @transform_6(%arg0: i32) -> (i32, i32) {
    %c0_i32 = arith.constant 0 : i32
    %c0_i32_0 = arith.constant 0 : i32
    %c0_i32_1 = arith.constant 0 : i32
    return %c0_i32, %c0_i32_0 : i32, i32
  }
  func.func @transform_7(%arg0: i32) -> (i32, i32) {
    %c0_i32 = arith.constant 0 : i32
    %c0_i32_0 = arith.constant 0 : i32
    return %arg0, %c0_i32 : i32, i32
  }
}

</mosaic_0001>

<bundles_post_ra>
// kernel: double_critic_forward.1
= control target key start
LH: loop header
LB: loop body
LE: loop exit
PB: predicated region body
PF: predicated region fallthrough
CT: control target
= control target key end

     0   :  { %12 = vsyncpa [#allocation3], 0  ;;  %s851_s24 = smov [#allocation2]   ;;  %s991_s0 = inlined_call_operand.vmem [shape: bf16[16,12], index: 0, kind: input, shape index: {}]   ;;  %s992_s1 = inlined_call_operand.vmem [shape: bf16[12,256], index: 1, kind: input, shape index: {}]   ;;  %s993_s2 = inlined_call_operand.vmem [shape: f32[1,256], index: 2, kind: input, shape index: {}]   ;;  %s994_s3 = inlined_call_operand.hbm [shape: bf16[256,256], index: 3, kind: input, shape index: {}]   ;;  %s995_s4 = inlined_call_operand.vmem [shape: f32[1,256], index: 4, kind: input, shape index: {}]   ;;  %s996_s5 = inlined_call_operand.vmem [shape: bf16[256,2], index: 5, kind: input, shape index: {}]   ;;  %s997_s6 = inlined_call_operand.vmem [shape: f32[1,2], index: 6, kind: input, shape index: {}]   ;;  %s998_s7 = inlined_call_operand.vmem [shape: f32[16,2], index: 7, kind: output, shape index: {}]  }
   0x1   :  { %s24_s25 = sshll.u32 %s851_s24, 4  ;;  %s827_s28 = scalar_lea.hbm %s994_s3, 4096  ;;  %s25_s25 = int_to_ptr.vmem [resolvable:$true] %s24_s25 }
   0x2   :  { %p828_p0 = scmp.ne.s32.totalorder %s994_s3, %s827_s28  ;;  %p831_p1 = scmp.lt.u32.totalorder %s827_s28, %s994_s3 }
   0x4   :  { %p833_p2 = pnand %p831_p1, %p828_p0 }
   0x6   :  { %836 = shalt.err (!%p833_p2)
}
   0x7   :  { %s837_s10 = scalar_lea.vmem %s25_s25, 4096  ;;  %p842_p4 = scmp.lt.s32.totalorder %s25_s25, %s25_s25 }
   0x8   :  { %p838_p3 = scmp.ne.s32.totalorder %s25_s25, %s837_s10  ;;  %p843_p5 = scmp.lt.s32.totalorder %s837_s10, %s837_s10 }
   0xa   :  { %p844_p6 = por %p843_p5, %p842_p4 }
   0xc   :  { %p845_p7 = pnand %p844_p6, %p838_p3 }
   0xe   :  { %848 = shalt.err (!%p845_p7)
}
   0xf   :  { %s852_s11 = smov 128   ;;  %s853_s12 = smov 8  }
  0x10   :  { %30 = dma.hbm_to_vmem [thread:$0]  %s994_s3, 4096, %s25_s25, [#allocation3], %s852_s11, %s852_s11, %s853_s12  }
  0x11   :  { %849 = dma.done.wait [#allocation3], 4096  }
  0x12   :  { %850 = vsyncadd [#allocation3], 4294963200  ;;  %v854_v0 = vmov 0   ;;  %vm74_vm0 = vcmask 1045504   ;;  %v730_v3 = vld [vmem:[%s991_s0] sm:$0xff]   ;;  %vm70_vm1 = vcmask 97280   ;;  %v47_v37 = vlaneseq }
  0x13   :  { %113 = vmatprep.mubr.bf16.mxu0 %v854_v0  ;;  %v727_v1 = vld [vmem:[%s992_s1 + $0x4] ss:$8 sps:$4 sm:$0x3f]   ;;  %v729_v2 = vld [vmem:[%s992_s1] ss:$8 sps:$4 sm:$0x3f]  }
  0x14   :  { %650 = vmatprep.subr.msk.bf16.mxu0 %vm74_vm0, %v727_v1  ;;  %v76_v4 = vsel %vm74_vm0, %v729_v2, 0  ;;  %v731_v5 = vld [vmem:[#allocation2 + $0x4] ss:$8 sps:$4 sm:$0xff]   ;;  %v733_v6 = vld [vmem:[#allocation2] ss:$8 sps:$4 sm:$0xff]   ;;  %v916_v38 = vshrl.u32 %v47_v37, 7 }
  0x15   :  { %82 = vmatpush1.bf16.msra.mxu0 %v76_v4  ;;  %v734_v7 = vld [vmem:[#allocation2 + $0x14] ss:$8 sps:$4 sm:$0xff]   ;;  %374 = vmatprep.subr.bf16.mxu1 %v731_v5  ;;  %v736_v8 = vld [vmem:[#allocation2 + $0x10] ss:$8 sps:$4 sm:$0xff]   ;;  %v737_v9 = vld [vmem:[#allocation2 + $0x24] ss:$8 sps:$4 sm:$0xff]  }
  0x16   :  { %375 = vmatpush1.bf16.msra.mxu1 %v733_v6  ;;  %v739_v10 = vld [vmem:[#allocation2 + $0x20] ss:$8 sps:$4 sm:$0xff]   ;;  %v740_v11 = vld [vmem:[#allocation2 + $0x34] ss:$8 sps:$4 sm:$0xff]   ;;  %v742_v12 = vld [vmem:[#allocation2 + $0x30] ss:$8 sps:$4 sm:$0xff]  }
  0x17   :  { %376 = vmatprep.subr.bf16.mxu1 %v734_v7  ;;  %v743_v13 = vld [vmem:[#allocation2 + $0x44] ss:$8 sps:$4 sm:$0xff]   ;;  %v745_v14 = vld [vmem:[#allocation2 + $0x40] ss:$8 sps:$4 sm:$0xff]   ;;  %v746_v15 = vld [vmem:[#allocation2 + $0x54] ss:$8 sps:$4 sm:$0xff]  }
  0x18   :  { %651 = vmatmul.mubr.msk.bf16.vlgmr.msra.gmra.mrb[0].mxu0 %vm70_vm1, %v730_v3  ;;  %v748_v16 = vld [vmem:[#allocation2 + $0x50] ss:$8 sps:$4 sm:$0xff]   ;;  %v749_v17 = vld [vmem:[#allocation2 + $0x64] ss:$8 sps:$4 sm:$0xff]   ;;  %v751_v18 = vld [vmem:[#allocation2 + $0x60] ss:$8 sps:$4 sm:$0xff]  }
  0x19   :  { %v752_v19 = vld [vmem:[#allocation2 + $0x74] ss:$8 sps:$4 sm:$0xff]   ;;  %v754_v20 = vld [vmem:[#allocation2 + $0x70] ss:$8 sps:$4 sm:$0xff]   ;;  %v755_v21 = vld [vmem:[#allocation2 + $0x84] ss:$8 sps:$4 sm:$0xff]  }
  0x1a   :  { %377 = vmatpush1.bf16.msra.mxu1 %v736_v8  ;;  %v757_v22 = vld [vmem:[#allocation2 + $0x80] ss:$8 sps:$4 sm:$0xff]   ;;  %v758_v23 = vld [vmem:[#allocation2 + $0x94] ss:$8 sps:$4 sm:$0xff]   ;;  %v760_v24 = vld [vmem:[#allocation2 + $0x90] ss:$8 sps:$4 sm:$0xff]  }
  0x1b   :  { %378 = vmatprep.subr.bf16.mxu1 %v737_v9  ;;  %v761_v25 = vld [vmem:[#allocation2 + $0xa4] ss:$8 sps:$4 sm:$0xff]   ;;  %v763_v26 = vld [vmem:[#allocation2 + $0xa0] ss:$8 sps:$4 sm:$0xff]   ;;  %v764_v27 = vld [vmem:[#allocation2 + $0xb4] ss:$8 sps:$4 sm:$0xff]  }
  0x1c   :  { %v766_v28 = vld [vmem:[#allocation2 + $0xb0] ss:$8 sps:$4 sm:$0xff]   ;;  %v767_v29 = vld [vmem:[#allocation2 + $0xc4] ss:$8 sps:$4 sm:$0xff]   ;;  %v769_v30 = vld [vmem:[#allocation2 + $0xc0] ss:$8 sps:$4 sm:$0xff]  }
  0x1d   :  { %v770_v31 = vld [vmem:[#allocation2 + $0xd4] ss:$8 sps:$4 sm:$0xff]   ;;  %v772_v32 = vld [vmem:[#allocation2 + $0xd0] ss:$8 sps:$4 sm:$0xff]   ;;  %v773_v33 = vld [vmem:[#allocation2 + $0xe4] ss:$8 sps:$4 sm:$0xff]  }
  0x1e   :  { %379 = vmatpush1.bf16.msra.mxu1 %v739_v10  ;;  %v775_v34 = vld [vmem:[#allocation2 + $0xe0] ss:$8 sps:$4 sm:$0xff]   ;;  %v776_v35 = vld [vmem:[#allocation2 + $0xf4] ss:$8 sps:$4 sm:$0xff]   ;;  %v778_v36 = vld [vmem:[#allocation2 + $0xf0] ss:$8 sps:$4 sm:$0xff]  }
  0x1f   :  { %380 = vmatprep.subr.bf16.mxu1 %v740_v11  ;;  %v49_v39 = vsub.s32 0, %v916_v38  ;;  %v45_v40 = vld [vmem:[%s993_s2] sm:$0x3]  ;;  %v53_v41 = vsub.s32 1, %v916_v38  ;;  %v786_v37 = vld [vmem:[%s996_s5 + $0x18] sm:$0xff]   ;;  %vm639_vm10 = vcmask 15360  }
  0x21   :  { %v50_v42 = vrot.slane %v45_v40, %v49_v39  ;;  %v54_v43 = vrot.slane %v45_v40, %v53_v41  ;;  %v787_v40 = vld [vmem:[%s996_s5 + $0x60] sm:$0xff]  }
  0x22   :  { %381 = vmatpush1.bf16.msra.mxu1 %v742_v12 }
  0x23   :  { %382 = vmatprep.subr.bf16.mxu1 %v743_v13 }
  0x26   :  { %383 = vmatpush1.bf16.msra.mxu1 %v745_v14 }
  0x27   :  { %384 = vmatprep.subr.bf16.mxu1 %v746_v15 }
  0x2a   :  { %385 = vmatpush1.bf16.msra.mxu1 %v748_v16 }
  0x2b   :  { %386 = vmatprep.subr.bf16.mxu1 %v749_v17 }
  0x2e   :  { %387 = vmatpush1.bf16.msra.mxu1 %v751_v18 }
  0x2f   :  { %388 = vmatprep.subr.bf16.mxu1 %v752_v19 }
  0x32   :  { %389 = vmatpush1.bf16.msra.mxu1 %v754_v20 }
  0x33   :  { %390 = vmatprep.subr.bf16.mxu1 %v755_v21 }
  0x36   :  { %391 = vmatpush1.bf16.msra.mxu1 %v757_v22 }
  0x37   :  { %392 = vmatprep.subr.bf16.mxu1 %v758_v23 }
  0x3a   :  { %393 = vmatpush1.bf16.msra.mxu1 %v760_v24 }
  0x3b   :  { %394 = vmatprep.subr.bf16.mxu1 %v761_v25 }
  0x3e   :  { %395 = vmatpush1.bf16.msra.mxu1 %v763_v26 }
  0x3f   :  { %396 = vmatprep.subr.bf16.mxu1 %v764_v27 }
  0x42   :  { %397 = vmatpush1.bf16.msra.mxu1 %v766_v28 }
  0x43   :  { %398 = vmatprep.subr.bf16.mxu1 %v767_v29 }
  0x46   :  { %399 = vmatpush1.bf16.msra.mxu1 %v769_v30  ;;  %v779_v30 = vld [vmem:[%s996_s5 + $0x40] sm:$0xff]  }
  0x47   :  { %400 = vmatprep.subr.bf16.mxu1 %v770_v31  ;;  %v780_v31 = vld [vmem:[%s996_s5] sm:$0xff]   ;;  %701 = vmatprep.subr.bf16.mxu0 %v779_v30 }
  0x48   :  { %702 = vmatpush3.bf16.msra.mxu0 %v780_v31 }
  0x4a   :  { %401 = vmatpush1.bf16.msra.mxu1 %v772_v32  ;;  %v781_v32 = vld [vmem:[%s996_s5 + $0x48] sm:$0xff]  }
  0x4b   :  { %402 = vmatprep.subr.bf16.mxu1 %v773_v33  ;;  %v782_v33 = vld [vmem:[%s996_s5 + $0x8] sm:$0xff]   ;;  %703 = vmatprep.subr.bf16.mxu0 %v781_v32 }
  0x4c   :  { %704 = vmatpush3.bf16.msra.mxu0 %v782_v33 }
  0x4e   :  { %403 = vmatpush1.bf16.msra.mxu1 %v775_v34  ;;  %v783_v34 = vld [vmem:[%s996_s5 + $0x50] sm:$0xff]  }
  0x4f   :  { %404 = vmatprep.subr.bf16.mxu1 %v776_v35  ;;  %v784_v35 = vld [vmem:[%s996_s5 + $0x10] sm:$0xff]   ;;  %705 = vmatprep.subr.bf16.mxu0 %v783_v34 }
  0x50   :  { %706 = vmatpush3.bf16.msra.mxu0 %v784_v35 }
  0x52   :  { %405 = vmatpush1.bf16.msra.mxu1 %v778_v36  ;;  %v785_v36 = vld [vmem:[%s996_s5 + $0x58] sm:$0xff]  }
  0x53   :  { %707 = vmatprep.subr.bf16.mxu0 %v785_v36  ;;  %v684_v36 = vld [vmem:[%s997_s6] ss:$0 sm:$0xff] }
  0x54   :  { %708 = vmatpush3.bf16.msra.mxu0 %v786_v37 }
  0x55   :  { %709 = vmatprep.subr.bf16.mxu0 %v787_v40 }
  0xeb   :  { %v115_v44 = vpop.f32.mrb[0].mxu0 }
  0xec   :  { %v116_v45 = vadd.f32 %v115_v44, %v50_v42  ;;  %v117_v46 = vpop.f32.mrb[1].mxu0  ;;  %v790_v44 = vld [vmem:[%s996_s5 + $0x28] sm:$0xff]  }
  0xed   :  { %v118_v47 = vadd.f32 %v117_v46, %v54_v43  ;;  %v119_v48 = vpop.f32.mrb[2].mxu0  ;;  %v792_v46 = vld [vmem:[%s996_s5 + $0x30] sm:$0xff]  }
  0xee   :  { %v124_v49 = vmin.f32 %v116_v45, 20.0  ;;  %v120_v50 = vadd.f32 %v119_v48, %v50_v42  ;;  %v121_v51 = vpop.f32.mrb[3].mxu0  ;;  %vm156_vm2 = vcmp.gt.f32.partialorder %v116_v45, 20.0  ;;  %v788_v42 = vld [vmem:[%s996_s5 + $0x20] sm:$0xff]   ;;  %v794_v48 = vld [vmem:[%s996_s5 + $0x38] sm:$0xff]  }
  0xef   :  { %v125_v52 = vmin.f32 %v118_v47, 20.0  ;;  %v122_v53 = vadd.f32 %v121_v51, %v54_v43  ;;  %vm157_vm4 = vcmp.gt.f32.partialorder %v118_v47, 20.0  ;;  %710 = vmatpush3.bf16.msra.mxu0 %v788_v42  ;;  %v789_v43 = vld [vmem:[%s996_s5 + $0x68] sm:$0xff]  }
  0xf0   :  { %v128_v54 = vmul.f32 1.442695, %v124_v49  ;;  %v126_v55 = vmin.f32 %v120_v50, 20.0  ;;  %vm158_vm3 = vcmp.gt.f32.partialorder %v120_v50, 20.0  ;;  %711 = vmatprep.subr.bf16.mxu0 %v789_v43  ;;  %v202_v49 = vld [vmem:[%s995_s4] sm:$0x3] }
  0xf1   :  { %v130_v56 = vmul.f32 1.442695, %v125_v52  ;;  %v127_v57 = vmin.f32 %v122_v53, 20.0  ;;  %vm159_vm5 = vcmp.gt.f32.partialorder %v122_v53, 20.0  ;;  %v211_v51 = vrot.slane %v202_v49, %v53_v41 }
  0xf2   :  { %795 = vpow2.f32 %v128_v54  ;;  %v132_v58 = vmul.f32 1.442695, %v126_v55 }
  0xf3   :  { %797 = vpow2.f32 %v130_v56  ;;  %v134_v59 = vmul.f32 1.442695, %v127_v57  ;;  %712 = vmatpush3.bf16.msra.mxu0 %v790_v44 }
  0xf4   :  { %799 = vpow2.f32 %v132_v58 }
  0xf5   :  { %801 = vpow2.f32 %v134_v59 }
  0xfc   :  { %v796_v60 = vpop.eup %795 }
  0xfd   :  { %v798_v61 = vpop.eup %797  ;;  %v136_v62 = vadd.f32 2.0, %v796_v60 }
  0xfe   :  { %v800_v63 = vpop.eup %799  ;;  %v137_v0 = vadd.f32 2.0, %v798_v61 }
  0xff   :  { %v802_v1 = vpop.eup %801  ;;  %v140_v2 = vmul.f32 %v796_v60, %v136_v62  ;;  %v138_v3 = vadd.f32 2.0, %v800_v63 }
 0x100   :  { %v139_v4 = vadd.f32 2.0, %v802_v1  ;;  %v141_v5 = vmul.f32 %v798_v61, %v137_v0 }
 0x101   :  { %v144_v6 = vadd.f32 2.0, %v140_v2  ;;  %v142_v7 = vmul.f32 %v800_v63, %v138_v3 }
 0x102   :  { %v143_v8 = vmul.f32 %v802_v1, %v139_v4  ;;  %v145_v9 = vadd.f32 2.0, %v141_v5 }
 0x103   :  { %803 = vrcp.f32 %v144_v6  ;;  %v146_v10 = vadd.f32 2.0, %v142_v7 }
 0x104   :  { %v147_v11 = vadd.f32 2.0, %v143_v8  ;;  %805 = vrcp.f32 %v145_v9 }
 0x105   :  { %807 = vrcp.f32 %v146_v10 }
 0x106   :  { %809 = vrcp.f32 %v147_v11 }
 0x10d   :  { %v804_v12 = vpop.eup %803 }
 0x10e   :  { %v806_v13 = vpop.eup %805  ;;  %v152_v14 = vmul.f32 %v804_v12, %v140_v2 }
 0x10f   :  { %v808_v15 = vpop.eup %807  ;;  %v153_v16 = vmul.f32 %v806_v13, %v141_v5 }
 0x110   :  { %v810_v17 = vpop.eup %809  ;;  %v160_v18 = vmul.f32 %v152_v14, %v116_v45  ;;  %v154_v19 = vmul.f32 %v808_v15, %v142_v7 }
 0x111   :  { %v155_v20 = vmul.f32 %v810_v17, %v143_v8  ;;  %v161_v21 = vmul.f32 %v153_v16, %v118_v47 }
 0x112   :  { %v162_v22 = vmul.f32 %v154_v19, %v120_v50  ;;  %v164_v24 = vsel %vm156_vm2, %v116_v45, %v160_v18  ;;  %v791_v45 = vld [vmem:[%s996_s5 + $0x70] sm:$0xff]  }
 0x113   :  { %v163_v23 = vmul.f32 %v155_v20, %v122_v53  ;;  %v165_v26 = vsel %vm157_vm4, %v118_v47, %v161_v21  ;;  %713 = vmatprep.subr.bf16.mxu0 %v791_v45  ;;  %v793_v47 = vld [vmem:[%s996_s5 + $0x78] sm:$0xff]  }
 0x114   :  { %v166_v25 = vsel %vm158_vm3, %v120_v50, %v162_v22  ;;  %714 = vmatpush3.bf16.msra.mxu0 %v792_v46  ;;  %v207_v50 = vrot.slane %v202_v49, %v49_v39 }
 0x115   :  { %v167_v27 = vsel %vm159_vm5, %v122_v53, %v163_v23  ;;  %v168_v28 = vpack.c.bf16 %v166_v25, %v164_v24  ;;  %715 = vmatprep.subr.bf16.mxu0 %v793_v47 }
 0x116   :  { %v169_v29 = vpack.c.bf16 %v167_v27, %v165_v26 }
 0x118   :  { %406 = vmatprep.mubr.bf16.mxu1 %v169_v29  ;;  %716 = vmatpush3.bf16.msra.mxu0 %v794_v48 }
 0x119   :  { %407 = vmatmul.mubr.bf16.vlgmr.msra.gmra.mrb[0].mxu1 %v168_v28 }
 0x1ec   :  { %v408_v52 = vpop.f32.mrb[0].mxu1 }
 0x1ed   :  { %v409_v53 = vadd.f32 %v408_v52, %v207_v50  ;;  %v410_v54 = vpop.f32.mrb[1].mxu1 }
 0x1ee   :  { %v411_v55 = vadd.f32 %v410_v54, %v211_v51  ;;  %v412_v56 = vpop.f32.mrb[2].mxu1 }
 0x1ef   :  { %v417_v57 = vmin.f32 %v409_v53, 20.0  ;;  %v413_v58 = vadd.f32 %v412_v56, %v207_v50  ;;  %v414_v59 = vpop.f32.mrb[3].mxu1  ;;  %vm449_vm6 = vcmp.gt.f32.partialorder %v409_v53, 20.0 }
 0x1f0   :  { %v418_v60 = vmin.f32 %v411_v55, 20.0  ;;  %v415_v61 = vadd.f32 %v414_v59, %v211_v51  ;;  %vm450_vm8 = vcmp.gt.f32.partialorder %v411_v55, 20.0 }
 0x1f1   :  { %v421_v62 = vmul.f32 1.442695, %v417_v57  ;;  %v419_v63 = vmin.f32 %v413_v58, 20.0  ;;  %vm451_vm7 = vcmp.gt.f32.partialorder %v413_v58, 20.0 }
 0x1f2   :  { %v423_v0 = vmul.f32 1.442695, %v418_v60  ;;  %v420_v1 = vmin.f32 %v415_v61, 20.0  ;;  %vm452_vm9 = vcmp.gt.f32.partialorder %v415_v61, 20.0 }
 0x1f3   :  { %811 = vpow2.f32 %v421_v62  ;;  %v425_v2 = vmul.f32 1.442695, %v419_v63 }
 0x1f4   :  { %813 = vpow2.f32 %v423_v0  ;;  %v427_v39 = vmul.f32 1.442695, %v420_v1 }
 0x1f5   :  { %815 = vpow2.f32 %v425_v2 }
 0x1f6   :  { %817 = vpow2.f32 %v427_v39 }
 0x1fd   :  { %v812_v38 = vpop.eup %811 }
 0x1fe   :  { %v814_v41 = vpop.eup %813  ;;  %v429_v3 = vadd.f32 2.0, %v812_v38 }
 0x1ff   :  { %v816_v4 = vpop.eup %815  ;;  %v430_v5 = vadd.f32 2.0, %v814_v41 }
 0x200   :  { %v818_v6 = vpop.eup %817  ;;  %v433_v7 = vmul.f32 %v812_v38, %v429_v3  ;;  %v431_v8 = vadd.f32 2.0, %v816_v4 }
 0x201   :  { %v434_v9 = vmul.f32 %v814_v41, %v430_v5  ;;  %v432_v10 = vadd.f32 2.0, %v818_v6 }
 0x202   :  { %v437_v11 = vadd.f32 2.0, %v433_v7  ;;  %v435_v12 = vmul.f32 %v816_v4, %v431_v8 }
 0x203   :  { %v438_v13 = vadd.f32 2.0, %v434_v9  ;;  %v436_v14 = vmul.f32 %v818_v6, %v432_v10 }
 0x204   :  { %819 = vrcp.f32 %v437_v11  ;;  %v439_v15 = vadd.f32 2.0, %v435_v12 }
 0x205   :  { %821 = vrcp.f32 %v438_v13  ;;  %v440_v16 = vadd.f32 2.0, %v436_v14 }
 0x206   :  { %823 = vrcp.f32 %v439_v15 }
 0x207   :  { %825 = vrcp.f32 %v440_v16 }
 0x20e   :  { %v820_v17 = vpop.eup %819 }
 0x20f   :  { %v822_v18 = vpop.eup %821  ;;  %v445_v19 = vmul.f32 %v820_v17, %v433_v7 }
 0x210   :  { %v824_v20 = vpop.eup %823  ;;  %v446_v21 = vmul.f32 %v822_v18, %v434_v9 }
 0x211   :  { %v826_v22 = vpop.eup %825  ;;  %v453_v23 = vmul.f32 %v445_v19, %v409_v53  ;;  %v447_v24 = vmul.f32 %v824_v20, %v435_v12 }
 0x212   :  { %v454_v25 = vmul.f32 %v446_v21, %v411_v55  ;;  %v448_v26 = vmul.f32 %v826_v22, %v436_v14 }
 0x213   :  { %v455_v27 = vmul.f32 %v447_v24, %v413_v58  ;;  %v457_v29 = vsel %vm449_vm6, %v409_v53, %v453_v23 }
 0x214   :  { %v456_v28 = vmul.f32 %v448_v26, %v415_v61  ;;  %v458_v31 = vsel %vm450_vm8, %v411_v55, %v454_v25 }
 0x215   :  { %v459_v30 = vsel %vm451_vm7, %v413_v58, %v455_v27 }
 0x216   :  { %v460_v32 = vsel %vm452_vm9, %v415_v61, %v456_v28  ;;  %v461_v33 = vpack.c.bf16 %v459_v30, %v457_v29 }
 0x217   :  { %v462_v34 = vpack.c.bf16 %v460_v32, %v458_v31 }
 0x219   :  { %630 = vmatprep.mubr.bf16.mxu0 %v462_v34 }
 0x21a   :  { %631 = vmatmul.mubr.bf16.vlgmr.msra.gmra.mrb[4].mxu0 %v461_v33 }
 0x2ed   :  { %v717_v35 = vpop.f32.mrb[4].mxu0 }
 0x2ee   :  { %v718_v37 = vpop.f32.mrb[5].mxu0 }
 0x2ef   :  { %v719_v40 = vadd.f32 %v718_v37, %v717_v35  ;;  %v720_v42 = vpop.f32.mrb[6].mxu0 }
 0x2f0   :  { %v721_v43 = vpop.f32.mrb[7].mxu0 }
 0x2f1   :  { %v633_v44 = vadd.f32 %v719_v40, %v684_v36  ;;  %v722_v45 = vadd.f32 %v721_v43, %v720_v42 }
 0x2f3   :  { %640 = vst.msk [vmem:[%s998_s7] sm:$0xff] %vm639_vm10, %v633_v44  ;;  %v636_v46 = vadd.f32 %v722_v45, %v684_v36 }
 0x2f5   :  { %641 = vst.msk [vmem:[%s998_s7 + $0x8] sm:$0xff] %vm639_vm10, %v636_v46 }
 0x2f6   :  { %646 = vsyncpa [#allocation3], 1 }

</bundles_post_ra>
